<compile_context>
chip_gen: v6e
topology: v6e:2x2x1
jax: 0.10.0
libtpu: 0.0.40
codegen_flags: <defaults>
</compile_context>

<pallas_src>
import math

import jax
import jax.numpy as jnp
from jax import lax
from jax.experimental import pallas as pl
from jax.experimental.pallas import tpu as pltpu

C_OUT = 3
KH = KW = 3
LANES = 128


def _round_up(x: int, m: int) -> int:
    return ((x + m - 1) // m) * m


def _lane_pad(w: int) -> int:
    # Pad scratch width: >= w+1 (at least one zero column past the data so the
    # lane rolls wrap through zeros) and a multiple of 128 so a logical roll is
    # exactly a physical lane rotation.
    return _round_up(w + 1, LANES)


def _vmem_capacity_bytes() -> int:
    """Per-generation VMEM capacity; conservative (v7x, 64 MiB) fallback."""
    try:
        cap = getattr(pltpu.get_tpu_info(), "vmem_capacity_bytes", None)
        if cap:
            return int(cap)
    except Exception:
        pass
    return 64 * 1024 * 1024


def _scalarnet_kernel(x_ref, w_ref, b_ref, o_ref, pad_ref):
    """One batch-block (Bt images) per grid step.

    x_ref:   (Bt, H, W)           f32 VMEM input block (C_in squeezed)
    w_ref:   (C_OUT*KH*KW,)       f32 SMEM, pre-scaled weights  (10 * w)
    b_ref:   (C_OUT,)             f32 SMEM, pre-folded bias     (10 * (b + 1))
    o_ref:   (Bt, C_OUT, H, WPo)  f32 VMEM output block, lane-dense (WPo % 128 == 0)
    pad_ref: (H+2, WP)            f32 VMEM scratch: zero-halo tile, reused per image
    """
    bt, h, w = x_ref.shape
    _, wp = pad_ref.shape
    out_wp = o_ref.shape[-1]

    # Zero ONLY the halo, once per grid step (top/bottom rows + right lane
    # pad); the interior rows are overwritten per image below.  No
    # program_id==0 guard: scratch persistence is not portable under v7x
    # megacore sharding of the parallel batch axis.
    pad_ref[0:1, :] = jnp.zeros((1, wp), jnp.float32)
    pad_ref[h + 1:h + 2, :] = jnp.zeros((1, wp), jnp.float32)
    pad_ref[1:h + 1, w:wp] = jnp.zeros((h, wp - w), jnp.float32)

    # Hoist the 27 scalar weights / 3 biases out of the per-image loop.
    wts = [[[w_ref[co * (KH * KW) + kh * KW + kw] for kw in range(KW)]
            for kh in range(KH)] for co in range(C_OUT)]
    bs = [b_ref[co] for co in range(C_OUT)]

    def per_image(b):
        pad_ref[1:h + 1, 0:w] = x_ref[b]
        accs = [jnp.zeros((h, wp), jnp.float32) for _ in range(C_OUT)]
        for kh in range(KH):
            # Sublane-offset ref slice, loaded once and reused by all (kw, co).
            row_win = pad_ref[kh:kh + h, :]
            for kw in range(KW):
                dw = kw - 1
                if dw == 0:
                    win = row_win
                else:
                    # XLU lane rotation; the wrapped-around column comes from
                    # the zero halo, so no masking is needed (lanes >= w are
                    # sliced off in the wrapper).
                    win = pltpu.roll(row_win, shift=(-dw) % wp, axis=1)
                for co in range(C_OUT):
                    accs[co] = accs[co] + wts[co][kh][kw] * win
        # Lane-dense stores: full (h, out_wp) slabs, no value slice/relayout.
        for co in range(C_OUT):
            acc = accs[co] if out_wp == wp else accs[co][:, 0:out_wp]
            o_ref[b, co, :, :] = acc + bs[co]

    if bt <= 4:
        # Tiny blocks (toy shapes): static unroll with concrete indices.
        for b in range(bt):
            per_image(b)
    else:
        def body(b, carry):
            per_image(b)
            return carry
        lax.fori_loop(0, bt, body, 0, unroll=False)


def scalarnet_forward(x_nchw, weight, bias, r=1.0, s=10.0):
    """x_nchw: (N, 1, H, W) f32; weight: (3, 1, 3, 3); bias: (3,)."""
    n, cin, h, w = x_nchw.shape
    assert cin == 1, "ScalarNet conv has a single input channel"
    x_sq = x_nchw[:, 0, :, :]                                  # (N, H, W), free

    # Fold the SimplesScalar activation (x + r) * s into the conv parameters.
    w_scaled = (weight.astype(jnp.float32) * s).reshape(-1)    # (27,)
    b_scaled = (bias.astype(jnp.float32) + r) * s              # (3,)

    wp = _lane_pad(w)                     # pad scratch width (>= w+1, %128==0)
    out_wp = _round_up(w, LANES)          # lane-dense output width

    # Per-generation VMEM sizing: stay well under v7x's 64 MiB physical cap,
    # use more headroom on v5e/v6e's 128 MiB.
    vmem_cap = _vmem_capacity_bytes()
    vmem_limit = min((vmem_cap * 3) // 4, 96 * 1024 * 1024)

    # Pick the batch tile Bt: double-buffered in+out blocks plus the pad
    # scratch must fit within half the VMEM limit; keep >= 2 grid steps when
    # possible so both v7x TensorCores get work.
    scratch_bytes = (h + 2) * wp * 4
    per_img_bytes = 2 * (h * w * 4) + 2 * (C_OUT * h * out_wp * 4)
    budget = max(per_img_bytes, vmem_limit // 2 - scratch_bytes)
    bt = max(1, budget // per_img_bytes)
    bt = min(bt, max(1, n // 2))          # leave >= 2 parallel grid steps (v7x)
    bt = min(bt, n)
    while n % bt:                         # make Bt divide N (no ragged block)
        bt -= 1
    grid = (n // bt,)

    cost = pl.CostEstimate(
        flops=2 * C_OUT * KH * KW * n * h * w,
        transcendentals=0,
        bytes_accessed=(n * h * w * 4
                        + n * C_OUT * h * out_wp * 4
                        + int(w_scaled.size) * 4 + int(b_scaled.size) * 4),
    )

    out_padded = pl.pallas_call(
        _scalarnet_kernel,
        out_shape=jax.ShapeDtypeStruct((n, C_OUT, h, out_wp), jnp.float32),
        grid=grid,
        in_specs=[
            pl.BlockSpec((bt, h, w), lambda i: (i, 0, 0)),
            pl.BlockSpec(memory_space=pltpu.MemorySpace.SMEM),
            pl.BlockSpec(memory_space=pltpu.MemorySpace.SMEM),
        ],
        out_specs=pl.BlockSpec((bt, C_OUT, h, out_wp), lambda i: (i, 0, 0, 0)),
        scratch_shapes=[pltpu.VMEM((h + 2, wp), jnp.float32)],
        compiler_params=pltpu.CompilerParams(
            dimension_semantics=("parallel",),   # shard batch blocks across TCs
            vmem_limit_bytes=vmem_limit,
        ),
        cost_estimate=cost,
    )(x_sq, w_scaled, b_scaled)

    # Lane padding is layout plumbing only; slice back to the logical width.
    return out_padded[..., :w]


def _init_params(key):
    """Deterministic init matching ScalarNet.__init__ semantics."""
    kw_key, kb_key = jax.random.split(key)
    # kaiming_normal_(mode='fan_out', nonlinearity='relu'): std = sqrt(2/fan_out)
    fan_out = C_OUT * KH * KW
    std = math.sqrt(2.0 / fan_out)
    weight = jax.random.normal(kw_key, (C_OUT, 1, KH, KW), jnp.float32) * std
    # Conv2d default bias init: U(-1/sqrt(fan_in), 1/sqrt(fan_in)), fan_in = 9
    fan_in = 1 * KH * KW
    bound = 1.0 / math.sqrt(fan_in)
    bias = jax.random.uniform(kb_key, (C_OUT,), jnp.float32,
                              minval=-bound, maxval=bound)
    return weight, bias


if __name__ == "__main__":
    key = jax.random.PRNGKey(0)
    k_x, k_p = jax.random.split(key)

    # Small NCHW input consistent with Conv2d(1, 3, ...): batch=2, C=1, 16x16
    x = jax.random.uniform(k_x, (2, 1, 16, 16), jnp.float32)
    weight, bias = _init_params(k_p)

    out = scalarnet_forward(x, weight, bias)
    out = jax.block_until_ready(out)

    # Plain-JAX reference: conv(pad=1) + bias, then (x + 1) * 10.
    ref_conv = jax.lax.conv_general_dilated(
        x, weight, window_strides=(1, 1), padding="SAME",
        dimension_numbers=("NCHW", "OIHW", "NCHW"),
    ) + bias[None, :, None, None]
    ref = (ref_conv + 1.0) * 10.0

    assert out.shape == (2, 3, 16, 16)
    assert jnp.allclose(out, ref, atol=1e-4, rtol=1e-4), float(
        jnp.max(jnp.abs(out - ref)))
    print("KERNEL_OK")
</pallas_src>

<mosaic_0001>
module attributes {stable_mosaic.version = 11 : i64} {
  func.func @_scalarnet_kernel(%arg0: i32, %arg1: memref<1x16x16xf32, #tpu.memory_space<vmem>>, %arg2: memref<27xf32, #tpu.memory_space<smem>>, %arg3: memref<3xf32, #tpu.memory_space<smem>>, %arg4: memref<1x3x16x128xf32, #tpu.memory_space<vmem>>, %arg5: memref<18x128xf32, #tpu.memory_space<vmem>>) attributes {dimension_semantics = [#tpu.dimension_semantics<parallel>], iteration_bounds = array<i64: 2>, scalar_prefetch = 0 : i64, scratch_operands = 1 : i64, tpu.core_type = #tpu.core_type<tc>, window_params = [{transform_indices = @transform_0, window_bounds = array<i64: 1, 16, 16>}, {transform_indices = @transform_1, window_bounds = array<i64: 27>}, {transform_indices = @transform_2, window_bounds = array<i64: 3>}, {transform_indices = @transform_3, window_bounds = array<i64: 1, 3, 16, 128>}]} {
    %cst = arith.constant 0.000000e+00 : f32
    %0 = vector.broadcast %cst : f32 to vector<1x128xf32>
    %c0 = arith.constant 0 : index
    %c0_0 = arith.constant 0 : index
    %1 = vector.load %arg5[%c0, %c0_0] : memref<18x128xf32, #tpu.memory_space<vmem>>, vector<1x128xf32>
    tpu.vector_store %arg5[%c0, %c0_0], %0 {strides = array<i32>} : memref<18x128xf32, #tpu.memory_space<vmem>>, vector<1x128xf32>,
    %cst_1 = arith.constant 0.000000e+00 : f32
    %2 = vector.broadcast %cst_1 : f32 to vector<1x128xf32>
    %c17 = arith.constant 17 : index
    %c0_2 = arith.constant 0 : index
    %3 = vector.load %arg5[%c17, %c0_2] : memref<18x128xf32, #tpu.memory_space<vmem>>, vector<1x128xf32>
    tpu.vector_store %arg5[%c17, %c0_2], %2 {strides = array<i32>} : memref<18x128xf32, #tpu.memory_space<vmem>>, vector<1x128xf32>,
    %cst_3 = arith.constant 0.000000e+00 : f32
    %4 = vector.broadcast %cst_3 : f32 to vector<16x112xf32>
    %c1 = arith.constant 1 : index
    %c16 = arith.constant 16 : index
    %5 = vector.load %arg5[%c1, %c16] : memref<18x128xf32, #tpu.memory_space<vmem>>, vector<16x112xf32>
    tpu.vector_store %arg5[%c1, %c16], %4 {strides = array<i32>} : memref<18x128xf32, #tpu.memory_space<vmem>>, vector<16x112xf32>,
    %c0_4 = arith.constant 0 : index
    %6 = memref.load %arg2[%c0_4] : memref<27xf32, #tpu.memory_space<smem>>
    %c1_5 = arith.constant 1 : index
    %7 = memref.load %arg2[%c1_5] : memref<27xf32, #tpu.memory_space<smem>>
    %c2 = arith.constant 2 : index
    %8 = memref.load %arg2[%c2] : memref<27xf32, #tpu.memory_space<smem>>
    %c3 = arith.constant 3 : index
    %9 = memref.load %arg2[%c3] : memref<27xf32, #tpu.memory_space<smem>>
    %c4 = arith.constant 4 : index
    %10 = memref.load %arg2[%c4] : memref<27xf32, #tpu.memory_space<smem>>
    %c5 = arith.constant 5 : index
    %11 = memref.load %arg2[%c5] : memref<27xf32, #tpu.memory_space<smem>>
    %c6 = arith.constant 6 : index
    %12 = memref.load %arg2[%c6] : memref<27xf32, #tpu.memory_space<smem>>
    %c7 = arith.constant 7 : index
    %13 = memref.load %arg2[%c7] : memref<27xf32, #tpu.memory_space<smem>>
    %c8 = arith.constant 8 : index
    %14 = memref.load %arg2[%c8] : memref<27xf32, #tpu.memory_space<smem>>
    %c9 = arith.constant 9 : index
    %15 = memref.load %arg2[%c9] : memref<27xf32, #tpu.memory_space<smem>>
    %c10 = arith.constant 10 : index
    %16 = memref.load %arg2[%c10] : memref<27xf32, #tpu.memory_space<smem>>
    %c11 = arith.constant 11 : index
    %17 = memref.load %arg2[%c11] : memref<27xf32, #tpu.memory_space<smem>>
    %c12 = arith.constant 12 : index
    %18 = memref.load %arg2[%c12] : memref<27xf32, #tpu.memory_space<smem>>
    %c13 = arith.constant 13 : index
    %19 = memref.load %arg2[%c13] : memref<27xf32, #tpu.memory_space<smem>>
    %c14 = arith.constant 14 : index
    %20 = memref.load %arg2[%c14] : memref<27xf32, #tpu.memory_space<smem>>
    %c15 = arith.constant 15 : index
    %21 = memref.load %arg2[%c15] : memref<27xf32, #tpu.memory_space<smem>>
    %c16_6 = arith.constant 16 : index
    %22 = memref.load %arg2[%c16_6] : memref<27xf32, #tpu.memory_space<smem>>
    %c17_7 = arith.constant 17 : index
    %23 = memref.load %arg2[%c17_7] : memref<27xf32, #tpu.memory_space<smem>>
    %c18 = arith.constant 18 : index
    %24 = memref.load %arg2[%c18] : memref<27xf32, #tpu.memory_space<smem>>
    %c19 = arith.constant 19 : index
    %25 = memref.load %arg2[%c19] : memref<27xf32, #tpu.memory_space<smem>>
    %c20 = arith.constant 20 : index
    %26 = memref.load %arg2[%c20] : memref<27xf32, #tpu.memory_space<smem>>
    %c21 = arith.constant 21 : index
    %27 = memref.load %arg2[%c21] : memref<27xf32, #tpu.memory_space<smem>>
    %c22 = arith.constant 22 : index
    %28 = memref.load %arg2[%c22] : memref<27xf32, #tpu.memory_space<smem>>
    %c23 = arith.constant 23 : index
    %29 = memref.load %arg2[%c23] : memref<27xf32, #tpu.memory_space<smem>>
    %c24 = arith.constant 24 : index
    %30 = memref.load %arg2[%c24] : memref<27xf32, #tpu.memory_space<smem>>
    %c25 = arith.constant 25 : index
    %31 = memref.load %arg2[%c25] : memref<27xf32, #tpu.memory_space<smem>>
    %c26 = arith.constant 26 : index
    %32 = memref.load %arg2[%c26] : memref<27xf32, #tpu.memory_space<smem>>
    %c0_8 = arith.constant 0 : index
    %33 = memref.load %arg3[%c0_8] : memref<3xf32, #tpu.memory_space<smem>>
    %c1_9 = arith.constant 1 : index
    %34 = memref.load %arg3[%c1_9] : memref<3xf32, #tpu.memory_space<smem>>
    %c2_10 = arith.constant 2 : index
    %35 = memref.load %arg3[%c2_10] : memref<3xf32, #tpu.memory_space<smem>>
    %c0_11 = arith.constant 0 : index
    %c0_12 = arith.constant 0 : index
    %c0_13 = arith.constant 0 : index
    %36 = vector.load %arg1[%c0_11, %c0_12, %c0_13] : memref<1x16x16xf32, #tpu.memory_space<vmem>>, vector<1x16x16xf32>
    %37 = vector.shape_cast %36 : vector<1x16x16xf32> to vector<16x16xf32>
    %c1_14 = arith.constant 1 : index
    %c0_15 = arith.constant 0 : index
    %38 = vector.load %arg5[%c1_14, %c0_15] : memref<18x128xf32, #tpu.memory_space<vmem>>, vector<16x16xf32>
    tpu.vector_store %arg5[%c1_14, %c0_15], %37 {strides = array<i32>} : memref<18x128xf32, #tpu.memory_space<vmem>>, vector<16x16xf32>,
    %cst_16 = arith.constant 0.000000e+00 : f32
    %39 = vector.broadcast %cst_16 : f32 to vector<16x128xf32>
    %cst_17 = arith.constant 0.000000e+00 : f32
    %40 = vector.broadcast %cst_17 : f32 to vector<16x128xf32>
    %cst_18 = arith.constant 0.000000e+00 : f32
    %41 = vector.broadcast %cst_18 : f32 to vector<16x128xf32>
    %c0_19 = arith.constant 0 : index
    %c0_20 = arith.constant 0 : index
    %42 = vector.load %arg5[%c0_19, %c0_20] : memref<18x128xf32, #tpu.memory_space<vmem>>, vector<16x128xf32>
    %c1_i32 = arith.constant 1 : i32
    %43 = tpu.dynamic_rotate %42 by %c1_i32 dim 1 : vector<16x128xf32>, i32 -> vector<16x128xf32>
    %44 = vector.broadcast %6 : f32 to vector<16x128xf32>
    %45 = arith.mulf %44, %43 : vector<16x128xf32>
    %46 = arith.addf %39, %45 : vector<16x128xf32>
    %47 = vector.broadcast %15 : f32 to vector<16x128xf32>
    %48 = arith.mulf %47, %43 : vector<16x128xf32>
    %49 = arith.addf %40, %48 : vector<16x128xf32>
    %50 = vector.broadcast %24 : f32 to vector<16x128xf32>
    %51 = arith.mulf %50, %43 : vector<16x128xf32>
    %52 = arith.addf %41, %51 : vector<16x128xf32>
    %53 = vector.broadcast %7 : f32 to vector<16x128xf32>
    %54 = arith.mulf %53, %42 : vector<16x128xf32>
    %55 = arith.addf %46, %54 : vector<16x128xf32>
    %56 = vector.broadcast %16 : f32 to vector<16x128xf32>
    %57 = arith.mulf %56, %42 : vector<16x128xf32>
    %58 = arith.addf %49, %57 : vector<16x128xf32>
    %59 = vector.broadcast %25 : f32 to vector<16x128xf32>
    %60 = arith.mulf %59, %42 : vector<16x128xf32>
    %61 = arith.addf %52, %60 : vector<16x128xf32>
    %c127_i32 = arith.constant 127 : i32
    %62 = tpu.dynamic_rotate %42 by %c127_i32 dim 1 : vector<16x128xf32>, i32 -> vector<16x128xf32>
    %63 = vector.broadcast %8 : f32 to vector<16x128xf32>
    %64 = arith.mulf %63, %62 : vector<16x128xf32>
    %65 = arith.addf %55, %64 : vector<16x128xf32>
    %66 = vector.broadcast %17 : f32 to vector<16x128xf32>
    %67 = arith.mulf %66, %62 : vector<16x128xf32>
    %68 = arith.addf %58, %67 : vector<16x128xf32>
    %69 = vector.broadcast %26 : f32 to vector<16x128xf32>
    %70 = arith.mulf %69, %62 : vector<16x128xf32>
    %71 = arith.addf %61, %70 : vector<16x128xf32>
    %c1_21 = arith.constant 1 : index
    %c0_22 = arith.constant 0 : index
    %72 = vector.load %arg5[%c1_21, %c0_22] : memref<18x128xf32, #tpu.memory_space<vmem>>, vector<16x128xf32>
    %c1_i32_23 = arith.constant 1 : i32
    %73 = tpu.dynamic_rotate %72 by %c1_i32_23 dim 1 : vector<16x128xf32>, i32 -> vector<16x128xf32>
    %74 = vector.broadcast %9 : f32 to vector<16x128xf32>
    %75 = arith.mulf %74, %73 : vector<16x128xf32>
    %76 = arith.addf %65, %75 : vector<16x128xf32>
    %77 = vector.broadcast %18 : f32 to vector<16x128xf32>
    %78 = arith.mulf %77, %73 : vector<16x128xf32>
    %79 = arith.addf %68, %78 : vector<16x128xf32>
    %80 = vector.broadcast %27 : f32 to vector<16x128xf32>
    %81 = arith.mulf %80, %73 : vector<16x128xf32>
    %82 = arith.addf %71, %81 : vector<16x128xf32>
    %83 = vector.broadcast %10 : f32 to vector<16x128xf32>
    %84 = arith.mulf %83, %72 : vector<16x128xf32>
    %85 = arith.addf %76, %84 : vector<16x128xf32>
    %86 = vector.broadcast %19 : f32 to vector<16x128xf32>
    %87 = arith.mulf %86, %72 : vector<16x128xf32>
    %88 = arith.addf %79, %87 : vector<16x128xf32>
    %89 = vector.broadcast %28 : f32 to vector<16x128xf32>
    %90 = arith.mulf %89, %72 : vector<16x128xf32>
    %91 = arith.addf %82, %90 : vector<16x128xf32>
    %c127_i32_24 = arith.constant 127 : i32
    %92 = tpu.dynamic_rotate %72 by %c127_i32_24 dim 1 : vector<16x128xf32>, i32 -> vector<16x128xf32>
    %93 = vector.broadcast %11 : f32 to vector<16x128xf32>
    %94 = arith.mulf %93, %92 : vector<16x128xf32>
    %95 = arith.addf %85, %94 : vector<16x128xf32>
    %96 = vector.broadcast %20 : f32 to vector<16x128xf32>
    %97 = arith.mulf %96, %92 : vector<16x128xf32>
    %98 = arith.addf %88, %97 : vector<16x128xf32>
    %99 = vector.broadcast %29 : f32 to vector<16x128xf32>
    %100 = arith.mulf %99, %92 : vector<16x128xf32>
    %101 = arith.addf %91, %100 : vector<16x128xf32>
    %c2_25 = arith.constant 2 : index
    %c0_26 = arith.constant 0 : index
    %102 = vector.load %arg5[%c2_25, %c0_26] : memref<18x128xf32, #tpu.memory_space<vmem>>, vector<16x128xf32>
    %c1_i32_27 = arith.constant 1 : i32
    %103 = tpu.dynamic_rotate %102 by %c1_i32_27 dim 1 : vector<16x128xf32>, i32 -> vector<16x128xf32>
    %104 = vector.broadcast %12 : f32 to vector<16x128xf32>
    %105 = arith.mulf %104, %103 : vector<16x128xf32>
    %106 = arith.addf %95, %105 : vector<16x128xf32>
    %107 = vector.broadcast %21 : f32 to vector<16x128xf32>
    %108 = arith.mulf %107, %103 : vector<16x128xf32>
    %109 = arith.addf %98, %108 : vector<16x128xf32>
    %110 = vector.broadcast %30 : f32 to vector<16x128xf32>
    %111 = arith.mulf %110, %103 : vector<16x128xf32>
    %112 = arith.addf %101, %111 : vector<16x128xf32>
    %113 = vector.broadcast %13 : f32 to vector<16x128xf32>
    %114 = arith.mulf %113, %102 : vector<16x128xf32>
    %115 = arith.addf %106, %114 : vector<16x128xf32>
    %116 = vector.broadcast %22 : f32 to vector<16x128xf32>
    %117 = arith.mulf %116, %102 : vector<16x128xf32>
    %118 = arith.addf %109, %117 : vector<16x128xf32>
    %119 = vector.broadcast %31 : f32 to vector<16x128xf32>
    %120 = arith.mulf %119, %102 : vector<16x128xf32>
    %121 = arith.addf %112, %120 : vector<16x128xf32>
    %c127_i32_28 = arith.constant 127 : i32
    %122 = tpu.dynamic_rotate %102 by %c127_i32_28 dim 1 : vector<16x128xf32>, i32 -> vector<16x128xf32>
    %123 = vector.broadcast %14 : f32 to vector<16x128xf32>
    %124 = arith.mulf %123, %122 : vector<16x128xf32>
    %125 = arith.addf %115, %124 : vector<16x128xf32>
    %126 = vector.broadcast %23 : f32 to vector<16x128xf32>
    %127 = arith.mulf %126, %122 : vector<16x128xf32>
    %128 = arith.addf %118, %127 : vector<16x128xf32>
    %129 = vector.broadcast %32 : f32 to vector<16x128xf32>
    %130 = arith.mulf %129, %122 : vector<16x128xf32>
    %131 = arith.addf %121, %130 : vector<16x128xf32>
    %132 = vector.broadcast %33 : f32 to vector<16x128xf32>
    %133 = arith.addf %125, %132 : vector<16x128xf32>
    %c0_29 = arith.constant 0 : index
    %c0_30 = arith.constant 0 : index
    %c0_31 = arith.constant 0 : index
    %c0_32 = arith.constant 0 : index
    %134 = vector.load %arg4[%c0_29, %c0_30, %c0_31, %c0_32] : memref<1x3x16x128xf32, #tpu.memory_space<vmem>>, vector<1x1x16x128xf32>
    %135 = vector.shape_cast %134 : vector<1x1x16x128xf32> to vector<16x128xf32>
    %136 = vector.shape_cast %133 : vector<16x128xf32> to vector<1x1x16x128xf32>
    tpu.vector_store %arg4[%c0_29, %c0_30, %c0_31, %c0_32], %136 {strides = array<i32>} : memref<1x3x16x128xf32, #tpu.memory_space<vmem>>, vector<1x1x16x128xf32>,
    %137 = vector.broadcast %34 : f32 to vector<16x128xf32>
    %138 = arith.addf %128, %137 : vector<16x128xf32>
    %c0_33 = arith.constant 0 : index
    %c1_34 = arith.constant 1 : index
    %c0_35 = arith.constant 0 : index
    %c0_36 = arith.constant 0 : index
    %139 = vector.load %arg4[%c0_33, %c1_34, %c0_35, %c0_36] : memref<1x3x16x128xf32, #tpu.memory_space<vmem>>, vector<1x1x16x128xf32>
    %140 = vector.shape_cast %139 : vector<1x1x16x128xf32> to vector<16x128xf32>
    %141 = vector.shape_cast %138 : vector<16x128xf32> to vector<1x1x16x128xf32>
    tpu.vector_store %arg4[%c0_33, %c1_34, %c0_35, %c0_36], %141 {strides = array<i32>} : memref<1x3x16x128xf32, #tpu.memory_space<vmem>>, vector<1x1x16x128xf32>,
    %142 = vector.broadcast %35 : f32 to vector<16x128xf32>
    %143 = arith.addf %131, %142 : vector<16x128xf32>
    %c0_37 = arith.constant 0 : index
    %c2_38 = arith.constant 2 : index
    %c0_39 = arith.constant 0 : index
    %c0_40 = arith.constant 0 : index
    %144 = vector.load %arg4[%c0_37, %c2_38, %c0_39, %c0_40] : memref<1x3x16x128xf32, #tpu.memory_space<vmem>>, vector<1x1x16x128xf32>
    %145 = vector.shape_cast %144 : vector<1x1x16x128xf32> to vector<16x128xf32>
    %146 = vector.shape_cast %143 : vector<16x128xf32> to vector<1x1x16x128xf32>
    tpu.vector_store %arg4[%c0_37, %c2_38, %c0_39, %c0_40], %146 {strides = array<i32>} : memref<1x3x16x128xf32, #tpu.memory_space<vmem>>, vector<1x1x16x128xf32>,
    return
  }
  func.func @transform_0(%arg0: i32) -> (i32, i32, i32) {
    %c0_i32 = arith.constant 0 : i32
    %c0_i32_0 = arith.constant 0 : i32
    %c0_i32_1 = arith.constant 0 : i32
    return %arg0, %c0_i32, %c0_i32_0 : i32, i32, i32
  }
  func.func @transform_1(%arg0: i32) -> i32 {
    %c0_i32 = arith.constant 0 : i32
    %c0_i32_0 = arith.constant 0 : i32
    return %c0_i32 : i32
  }
  func.func @transform_2(%arg0: i32) -> i32 {
    %c0_i32 = arith.constant 0 : i32
    %c0_i32_0 = arith.constant 0 : i32
    return %c0_i32 : i32
  }
  func.func @transform_3(%arg0: i32) -> (i32, i32, i32, i32) {
    %c0_i32 = arith.constant 0 : i32
    %c0_i32_0 = arith.constant 0 : i32
    %c0_i32_1 = arith.constant 0 : i32
    %c0_i32_2 = arith.constant 0 : i32
    return %arg0, %c0_i32, %c0_i32_0, %c0_i32_1 : i32, i32, i32, i32
  }
}

</mosaic_0001>

<bundles_post_ra>
// kernel: tpu_custom_call.1
= control target key start
LH: loop header
LB: loop body
LE: loop exit
PB: predicated region body
PF: predicated region fallthrough
CT: control target
= control target key end

     0   :  { %s1235_s0 = inlined_call_operand.hbm [shape: f32[2,16,16], index: 0, kind: input, shape index: {}]   ;;  %s1236_s1 = inlined_call_operand.vmem [shape: f32[27], index: 1, kind: input, shape index: {}]   ;;  %s1237_s2 = inlined_call_operand.vmem [shape: f32[3], index: 2, kind: input, shape index: {}]   ;;  %s1238_s3 = inlined_call_operand.hbm [shape: f32[2,3,16,128], index: 3, kind: output, shape index: {}]  }
   0x1   :  { %1248 = sst [smem:[#allocation19_spill]] %s1235_s0 }
   0x2   :  { %1249 = sst [smem:[#allocation20_spill]] %s1236_s1 }
   0x3   :  { %1250 = sst [smem:[#allocation21_spill]] %s1237_s2 }
   0x4   :  { %8 = vsyncpa [#allocation4], 0 }
   0x5   :  { %10 = vsyncpa [#allocation4 + $0x1], 0 }
   0x6   :  { %11 = vsyncpa [#allocation6], 0 }
   0x7   :  { %12 = vsyncpa [#allocation9], 0 }
   0x8   :  { %13 = vsyncpa [#allocation5], 0 }
   0x9   :  { %15 = vsyncpa [#allocation5 + $0x1], 0  ;;  %s834_s12 = smov 0   ;;  %s836_s13 = smov 0  }
   0xa   :  { %s838_s14 = smov 0   ;;  %s840_s15 = smov 0  }
   0xb LB: > { %1251 = sst [smem:[#allocation15_spill]] %s793_s13  ;;  %s855_s16 = sadd.s32 4294967295, %s801_s15   ;;  %s801_s15 = sphi %s840_s15, %s1275_s15   ;;  %s797_s14 = sphi %s838_s14, %s1278_s14   ;;  %s793_s13 = sphi %s836_s13, %s1277_s13   ;;  %s789_s12 = sphi %s834_s12, %s1276_s12  }
   0xc   : > { %1252 = sst [smem:[#allocation16_spill]] %s797_s14  ;;  %s547_s17 = sadd.s32 4294967294, %s801_s15  }
   0xd   : > { %s859_s18 = sadd.s32 1, %s801_s15   ;;  %s28_s19 = sadd.s32 1, %s797_s14 }
   0xe   : > { %1253 = sst [smem:[#allocation17_spill]] %s859_s18  ;;  %s25_s20 = ssub.s32 %s801_s15, %s859_s18 }
   0xf   : > { %p35_p0 = scmp.ne.s32.totalorder %s797_s14, %s793_s13  ;;  %p26_p1 = scmp.eq.s32.totalorder %s25_s20, 0 }
  0x10   : > { %p36_p2 = scmp.eq.s32.totalorder %s801_s15, 0  ;;  %p41_p3 = scmp.ne.s32.totalorder %s793_s13, %s789_s12 }
  0x11   : > { %p1239_p4 = scmp.eq.s32.totalorder %s855_s16, 0  ;;  %p107_p7 = scmp.eq.s32.totalorder %s855_s16, 1 }
  0x12   : > { %s871_s21 = scalar_select %p26_p1, %s797_s14, %s28_s19  }
  0x13   : > { %p873_p5 = por %p36_p2, %p35_p0  ;;  %p879_p6 = por %p1239_p4, %p41_p3 }
  0x14   : > { %1254 = sst [smem:[#allocation18_spill]] %s871_s21  ;;  %p113_p8 = scmp.eq.s32.totalorder %s547_s17, 1 }
  0x15   : > { %s1256_s23 = scalar_select %p879_p6, 1, 0 }
  0x16   : > { %p548_p9 = scmp.ge.s32.totalorder %s801_s15, 1  ;;  %p120_p10 = scmp.lt.s32.totalorder %s801_s15, 3 }
  0x17   : > { %p886_p11 = por %p107_p7, %p35_p0  ;;  %p890_p12 = por %p113_p8, %p41_p3 }
  0x18   : > { %p894_p13 = pnand %p548_p9, %p120_p10  ;;  %s1260_s1 = sld [smem:[#allocation20_spill]] }
  0x19   : > { %s1257_s24 = scalar_select %p886_p11, 1, 0 }
  0x1a   : > { %s1258_s25 = scalar_select %p890_p12, 1, 0 }
  0x1b   : > { %s1259_s26 = scalar_select %p894_p13, 1, 0 }
  0x1c   : > { %p609_p1 = pneg %p894_p13  ;;  %p626_p2 = scmp.lt.s32.totalorder %s801_s15, 2 }
  0x1d   : > { %s1262_s2 = sld [smem:[#allocation21_spill]] }
  0x1e   : > { %s133_s29 = sshll.u32 %s1260_s1, 4  ;;  %p907_p7 = pnand %p609_p1, %p1239_p4  ;;  %s134_s29 = int_to_ptr.vmem [resolvable:$true] %s133_s29 }
  0x1f   : > { %p916_p3 = pnand %p626_p2, %p873_p5  ;;  %s671_s8 = scalar_lea.vmem %s134_s29, 16 }
  0x20   : > { %p672_p8 = scmp.ne.s32.totalorder %s134_s29, %s671_s8  ;;  %p673_p9 = pneg %p907_p7 }
  0x21   : > { %s1263_s7 = scalar_select %p916_p3, 1, 0 }
  0x22   : > { %p674_p10 = pnand %p673_p9, %p672_p8  ;;  %p679_p0 = scmp.lt.s32.totalorder %s134_s29, %s134_s29 }
  0x23   : > { %s144_s6 = sshll.u32 %s1262_s2, 4  ;;  %p680_p4 = scmp.lt.s32.totalorder %s671_s8, %s671_s8  ;;  %s145_s6 = int_to_ptr.vmem [resolvable:$true] %s144_s6 }
  0x24   : > { %p675_p1 = pneg %p674_p10 }
  0x25   : > { %p681_p12 = por %p680_p4, %p679_p0 }
  0x27   : > { %p682_p11 = pnand %p681_p12, %p675_p1 }
  0x29   : > { %685 = shalt.err (!%p682_p11)
}
  0x2a   : > { %s803_s9 = smov [#allocation7]   ;;  %s155_s10 = sand.u32 1, %s797_s14  }
  0x2b   : > { %612 = dma.vmem_to_smem (!%p907_p7), %s134_s29, 16, %s803_s9, [#allocation6]  }
  0x2c   : > { %s686_s11 = scalar_lea.vmem %s145_s6, 16  ;;  %p694_p8 = scmp.lt.s32.totalorder %s145_s6, %s145_s6 }
  0x2d   : > { %p687_p5 = scmp.ne.s32.totalorder %s145_s6, %s686_s11  ;;  %p695_p10 = scmp.lt.s32.totalorder %s686_s11, %s686_s11 }
  0x2f   : > { %p689_p2 = pnand %p687_p5, %p673_p9  ;;  %p696_p13 = por %p695_p10, %p694_p8 }
  0x31   : > { %p690_p6 = pneg %p689_p2 }
  0x33   : > { %p697_p3 = pnand %p696_p13, %p690_p6 }
  0x35   : > { %700 = shalt.err (!%p697_p3)
}
  0x36   : > { %s804_s17 = smov [#allocation8]   ;;  %s552_s19 = sshll.u32 %s155_s10, 4 }
  0x37   : > { %615 = dma.vmem_to_smem (!%p907_p7), %s145_s6, 16, %s804_s17, [#allocation9]  }
  0x38   : > { %s594_s20 = sshll.u32 %s801_s15, 8  ;;  %s1264_s0 = sld [smem:[#allocation19_spill]] }
  0x39   : > { %s159_s29 = scalar_lea.vmem [#allocation3], %s552_s19  ;;  %s941_s5 = scalar_lea.sflag [#allocation4], %s155_s10 }
  0x3a   : > { %s166_s4 = sshll.u32 %s159_s29, 4  ;;  %p1265_p6 = scmp.ne.s32.totalorder %s1263_s7, 0  ;;  %s939_s4 = int_to_ptr.vmem [resolvable:$true] %s166_s4 }
  0x3c   : > { %p703_p11 = pneg %p1265_p6 }
  0x3e   : > { %s937_s28 = scalar_lea.hbm %s1264_s0, %s594_s20  ;;  %s706_s9 = scalar_lea.hbm %s1264_s0, 512 }
  0x3f   : > { %s701_s30 = scalar_lea.hbm %s937_s28, 256  ;;  %p707_p0 = scmp.lt.s32.totalorder %s937_s28, %s1264_s0 }
  0x40   : > { %p702_p4 = scmp.ne.s32.totalorder %s937_s28, %s701_s30  ;;  %p708_p7 = scmp.lt.s32.totalorder %s706_s9, %s701_s30 }
  0x42   : > { %p704_p12 = pnand %p703_p11, %p702_p4  ;;  %p709_p3 = por %p708_p7, %p707_p0 }
  0x44   : > { %p705_p13 = pneg %p704_p12 }
  0x46   : > { %p710_p9 = pnand %p709_p3, %p705_p13 }
  0x48   : > { %713 = shalt.err (!%p710_p9)
}
  0x49   : > { %s714_s10 = scalar_lea.vmem %s939_s4, 256  ;;  %s805_s19 = smov [#allocation3]  }
  0x4a   : > { %p715_p1 = scmp.ne.s32.totalorder %s939_s4, %s714_s10  ;;  %s719_s20 = sshll.u32 %s805_s19, 4  ;;  %s720_s20 = int_to_ptr.vmem [resolvable:$false] %s719_s20 }
  0x4b   : > { %s721_s22 = scalar_lea.vmem %s720_s20, 512  ;;  %p722_p8 = scmp.lt.s32.totalorder %s939_s4, %s720_s20 }
  0x4c   : > { %p717_p5 = pnand %p715_p1, %p703_p11  ;;  %p723_p10 = scmp.lt.s32.totalorder %s721_s22, %s714_s10 }
  0x4e   : > { %p718_p2 = pneg %p717_p5  ;;  %p724_p4 = por %p723_p10, %p722_p8 }
  0x50   : > { %p725_p12 = pnand %p724_p4, %p718_p2 }
  0x52   : > { %728 = shalt.err (!%p725_p12)
}
  0x53   : > { %s806_s27 = smov 128   ;;  %s807_s29 = smov 8  }
  0x54   : > { %619 = dma.hbm_to_vmem [thread:$0]  (!%p1265_p6), %s937_s28, 256, %s939_s4, %s941_s5, %s806_s27, %s806_s27, %s807_s29  }
  0x55   : > { %p1266_p11 = scmp.ne.s32.totalorder %s1259_s26, 0 }
  0x56   : > { %s965_s30 = sand.u32 (!%p1266_p11), 1, %s793_s13   ;;  %p1267_p13 = scmp.ne.s32.totalorder (!%p1266_p11), %s1256_s23, 0 }
  0x57   : > { %178 = sbr.rel (%p1266_p11) target bundleno = 271 (0x10f), region = 32  ;;  %s556_s6 = sshll.u32 (!%p1266_p11), %s965_s30, 4 }
  0x58   : > { %s181_s8 = scalar_lea.sflag (!%p1266_p11), [#allocation4], %s965_s30  ;;  %s184_s9 = scalar_lea.vmem (!%p1266_p11), [#allocation3], %s556_s6 }
  0x5c   : > { %772 = dma.done.wait (%p1267_p13), %s181_s8, 256  }
  0x5d   : > { %774 = vsyncadd (%p1267_p13), %s181_s8, 4294967040  ;;  %p1268_p0 = scmp.eq.s32.totalorder %s855_s16, 0 }
  0x5f   : > { %776 = dma.done.wait (%p1268_p0), [#allocation6], 16   ;;  %p1269_p6 = pmov %p1268_p0 }
  0x60   : > { %p1270_p7 = pmov %p1268_p0 }
  0x61   : > { %778 = vsyncadd (%p1269_p6), [#allocation6], 4294967280 }
  0x62   : > { %780 = dma.done.wait (%p1270_p7), [#allocation9], 16   ;;  %p1271_p3 = pmov %p1268_p0 }
  0x64   : > { %782 = vsyncadd (%p1271_p3), [#allocation9], 4294967280 }
  0x65   : > { %197 = sfence }
  0x66   : > { %vm218_vm0 = vcmask 1047680   ;;  %v251_v0 = vld [vmem:[%s184_s9] sm:$0xff]  ;;  %vm253_vm1 = vcmask 130048   ;;  %v808_v1 = vmov 0.0   ;;  %v252_v2 = vld [vmem:[%s184_s9 + $0x8] sm:$0xff]  ;;  %s809_s23 = smov 127  }
  0x67   : > { %216 = vst [vmem:[#allocation2] sm:$0x1] %v808_v1  ;;  %219 = vst.msk [vmem:[#allocation2 + $0x1] sm:$0xff] %vm218_vm0, %v808_v1  ;;  %s810_s26 = smov 1   ;;  %s997_s7 = sld [smem:[#allocation7 + $0x2]] }
  0x68   : > { %217 = vst [vmem:[#allocation2 + $0x11] sm:$0x1] %v808_v1  ;;  %220 = vst.msk [vmem:[#allocation2 + $0x9] sm:$0xff] %vm218_vm0, %v808_v1  ;;  %s999_s28 = sld [smem:[#allocation7 + $0xb]]  ;;  %p1272_p1 = scmp.ne.s32.totalorder %s1257_s24, 0 }
  0x69   : > { %254 = vst.msk [vmem:[#allocation2 + $0x1] sm:$0xff] %vm253_vm1, %v251_v0  ;;  %255 = vst.msk [vmem:[#allocation2 + $0x9] sm:$0xff] %vm253_vm1, %v252_v2  ;;  %s1001_s4 = sld [smem:[#allocation7 + $0x14]] }
  0x6a   : > { %s1003_s5 = sld [smem:[#allocation7]] }
  0x6b   : > { %s1005_s11 = sld [smem:[#allocation7 + $0x1]] }
  0x6c   : > { %s1007_s17 = sld [smem:[#allocation7 + $0x9]] }
  0x6d   : > { %s1009_s10 = sld [smem:[#allocation7 + $0xa]]  ;;  %v296_v10 = vstv %s997_s7  ;;  %s595_s7 = smul.u32 48, %s965_s30 }
  0x6e   : > { %s1011_s19 = sld [smem:[#allocation7 + $0x12]]  ;;  %v301_v11 = vstv %s999_s28 }
  0x6f   : > { %s1013_s20 = sld [smem:[#allocation7 + $0x13]]  ;;  %v306_v14 = vstv %s1001_s4 }
  0x70   : > { %v256_v3 = vld [vmem:[#allocation2] sm:$0xff]  ;;  %v257_v4 = vld [vmem:[#allocation2 + $0x8] sm:$0xff]  ;;  %s1015_s22 = sld [smem:[#allocation7 + $0x3]]  ;;  %v262_v15 = vstv %s1003_s5  ;;  %s439_s5 = scalar_lea.sflag [#allocation5], %s965_s30 }
  0x71   : > { %292 = vrot.lane.b32.xlu1 %v256_v3, %s809_s23  ;;  %258 = vrot.lane.b32.xlu0 %v256_v3, %s810_s26  ;;  %v981_v5 = vld [vmem:[#allocation2 + $0x9] sm:$0xff]  ;;  %v983_v6 = vld [vmem:[#allocation2 + $0x1] sm:$0xff]  ;;  %s1017_s27 = sld [smem:[#allocation7 + $0xc]]  ;;  %v277_v9 = vstv %s1005_s11 }
  0x72   : > { %v989_v7 = vld [vmem:[#allocation2 + $0xa] sm:$0xff]  ;;  %v991_v8 = vld [vmem:[#allocation2 + $0x2] sm:$0xff]  ;;  %s1019_s29 = sld [smem:[#allocation7 + $0x15]]  ;;  %v267_v16 = vstv %s1007_s17  ;;  %v278_v17 = vmul.f32 %v277_v9, %v256_v3  ;;  %v279_v19 = vmul.f32 %v277_v9, %v257_v4 }
  0x73   : > { %s1021_s6 = sld [smem:[#allocation7 + $0x4]]  ;;  %v282_v12 = vstv %s1009_s10 }
  0x74   : > { %s1023_s8 = sld [smem:[#allocation7 + $0x5]]  ;;  %v272_v18 = vstv %s1011_s19  ;;  %v283_v22 = vmul.f32 %v282_v12, %v256_v3  ;;  %v284_v24 = vmul.f32 %v282_v12, %v257_v4  ;;  %s811_s19 = smov [#allocation10]  }
  0x75   : > { %294 = vrot.lane.b32.xlu1 %v257_v4, %s809_s23  ;;  %260 = vrot.lane.b32.xlu0 %v257_v4, %s810_s26  ;;  %s1025_s9 = sld [smem:[#allocation7 + $0xd]]  ;;  %v287_v13 = vstv %s1013_s20  ;;  %s733_s20 = sshll.u32 %s811_s19, 4  ;;  %s734_s20 = int_to_ptr.vmem [resolvable:$false] %s733_s20 }
  0x76   : > { %s1031_s0 = sld [smem:[#allocation7 + $0x17]]  ;;  %v288_v23 = vmul.f32 %v287_v13, %v256_v3  ;;  %v289_v26 = vmul.f32 %v287_v13, %v257_v4  ;;  %v317_v27 = vstv %s1015_s22  ;;  %s735_s22 = scalar_lea.vmem %s734_s20, 1536 }
  0x77   : > { %s1033_s1 = sld [smem:[#allocation7 + $0x6]]  ;;  %v322_v28 = vstv %s1017_s27 }
  0x78   : > { %s1035_s2 = sld [smem:[#allocation7 + $0xf]]  ;;  %v327_v29 = vstv %s1019_s29 }
  0x79   : > { %315 = vrot.lane.b32.xlu1 %v981_v5, %s810_s26  ;;  %313 = vrot.lane.b32.xlu0 %v983_v6, %s810_s26  ;;  %s1037_s21 = sld [smem:[#allocation7 + $0x18]]  ;;  %v332_v20 = vstv %s1021_s6 }
  0x7a   : > { %s1040_s14 = sld [smem:[#allocation7 + $0x7]]  ;;  %v1067_v30 = vmul.f32 %v332_v20, %v981_v5  ;;  %v351_v32 = vstv %s1023_s8  ;;  %v1074_v33 = vmul.f32 %v332_v20, %v983_v6 }
  0x7b   : > { %s1042_s13 = sld [smem:[#allocation7 + $0x10]]  ;;  %v337_v21 = vstv %s1025_s9 }
  0x7c   : > { %s1048_s18 = sld [smem:[#allocation7 + $0x19]]  ;;  %v1070_v31 = vmul.f32 %v337_v21, %v981_v5  ;;  %v1081_v36 = vmul.f32 %v337_v21, %v983_v6  ;;  %v361_v40 = vstv %s1031_s0  ;;  %s596_s0 = smul.u32 768, %s855_s16 }
  0x7d   : > { %349 = vrot.lane.b32.xlu1 %v981_v5, %s809_s23  ;;  %347 = vrot.lane.b32.xlu0 %v983_v6, %s809_s23  ;;  %s1053_s11 = sld [smem:[#allocation7 + $0x8]]  ;;  %v372_v42 = vstv %s1033_s1  ;;  %s215_s1 = scalar_lea.vmem [#allocation10], %s595_s7 }
  0x7e   : > { %s1058_s10 = sld [smem:[#allocation7 + $0x11]]  ;;  %v377_v45 = vstv %s1035_s2  ;;  %s452_s2 = sshll.u32 %s215_s1, 4  ;;  %s1192_s2 = int_to_ptr.vmem [resolvable:$true] %s452_s2 }
  0x7f   : > { %s1061_s4 = sld [smem:[#allocation7 + $0x1a]]  ;;  %v382_v46 = vstv %s1037_s21  ;;  %s1190_s28 = scalar_lea.hbm %s1238_s3, %s596_s0 }
  0x80   : > { %v387_v37 = vstv %s1040_s14  ;;  %s1097_s14 = sld [smem:[#allocation8]]  ;;  %s729_s17 = scalar_lea.vmem %s1192_s2, 768 }
  0x81   : > { %370 = vrot.lane.b32.xlu1 %v989_v7, %s810_s26  ;;  %368 = vrot.lane.b32.xlu0 %v991_v8, %s810_s26  ;;  %s1029_s26 = sld [smem:[#allocation7 + $0x16]]  ;;  %v392_v43 = vstv %s1042_s13  ;;  %v1094_v50 = vmul.f32 %v387_v37, %v989_v7  ;;  %v1104_v54 = vmul.f32 %v387_v37, %v991_v8  ;;  %p730_p9 = scmp.ne.s32.totalorder %s1192_s2, %s729_s17 }
  0x82   : > { %v397_v47 = vstv %s1048_s18  ;;  %v1100_v52 = vmul.f32 %v392_v43, %v989_v7  ;;  %v1107_v55 = vmul.f32 %v392_v43, %v991_v8  ;;  %s1124_s13 = sld [smem:[#allocation8 + $0x1]]  ;;  %p736_p8 = scmp.lt.s32.totalorder %s1192_s2, %s734_s20 }
  0x83   : > { %v406_v51 = vstv %s1053_s11  ;;  %v1110_v60 = vmul.f32 %v397_v47, %v989_v7  ;;  %v1118_v1 = vmul.f32 %v397_v47, %v991_v8  ;;  %s1127_s18 = sld [smem:[#allocation8 + $0x2]]  ;;  %p731_p5 = pnand %p730_p9, %p1272_p1 }
  0x84   : > { %v411_v53 = vstv %s1058_s10  ;;  %p737_p10 = scmp.lt.s32.totalorder %s735_s22, %s729_s17 }
  0x85   : > { %404 = vrot.lane.b32.xlu1 %v989_v7, %s809_s23  ;;  %402 = vrot.lane.b32.xlu0 %v991_v8, %s809_s23  ;;  %s1027_s23 = sld [smem:[#allocation7 + $0xe]]  ;;  %v416_v61 = vstv %s1061_s4  ;;  %p732_p2 = pneg %p731_p5 }
  0x86   : > { %p738_p4 = por %p737_p10, %p736_p8 }
  0x87   : > { %v342_v25 = vstv %s1029_s26 }
  0x88   : > { %v1077_v34 = vmul.f32 %v342_v25, %v981_v5  ;;  %v1086_v41 = vmul.f32 %v342_v25, %v983_v6  ;;  %p739_p12 = pnand %p738_p4, %p732_p2 }
  0x8b   : > { %v356_v35 = vstv %s1027_s23 }
  0xe3   : > { %v293_v38 = vpop.permute.xlu1 %292  ;;  %v259_v39 = vpop.permute.xlu0 %258 }
  0xe4   : > { %v263_v44 = vmul.f32 %v262_v15, %v259_v39  ;;  %v268_v48 = vmul.f32 %v267_v16, %v259_v39  ;;  %v273_v49 = vmul.f32 %v272_v18, %v259_v39  ;;  %v297_v62 = vmul.f32 %v296_v10, %v293_v38 }
  0xe5   : > { %v302_v63 = vmul.f32 %v301_v11, %v293_v38  ;;  %v307_v2 = vmul.f32 %v306_v14, %v293_v38 }
  0xe6   : > { %v280_v56 = vadd.f32 %v278_v17, %v263_v44  ;;  %v285_v57 = vadd.f32 %v283_v22, %v268_v48  ;;  %v290_v3 = vadd.f32 %v288_v23, %v273_v49 }
  0xe7   : > { %v295_v58 = vpop.permute.xlu1 %294  ;;  %v261_v59 = vpop.permute.xlu0 %260 }
  0xe8   : > { %v264_v0 = vmul.f32 %v262_v15, %v261_v59  ;;  %v269_v4 = vmul.f32 %v267_v16, %v261_v59  ;;  %v274_v5 = vmul.f32 %v272_v18, %v261_v59  ;;  %v298_v6 = vmul.f32 %v296_v10, %v295_v58 }
  0xe9   : > { %v303_v9 = vmul.f32 %v301_v11, %v295_v58  ;;  %v308_v12 = vmul.f32 %v306_v14, %v295_v58  ;;  %v299_v22 = vadd.f32 %v297_v62, %v280_v56  ;;  %v304_v15 = vadd.f32 %v302_v63, %v285_v57 }
  0xea   : > { %v281_v7 = vadd.f32 %v279_v19, %v264_v0  ;;  %v286_v13 = vadd.f32 %v284_v24, %v269_v4  ;;  %v291_v17 = vadd.f32 %v289_v26, %v274_v5  ;;  %v309_v14 = vadd.f32 %v307_v2, %v290_v3 }
  0xeb   : > { %v316_v20 = vpop.permute.xlu1 %315  ;;  %v314_v21 = vpop.permute.xlu0 %313  ;;  %v421_v24 = vstv %s1097_s14 }
  0xec   : > { %v300_v25 = vadd.f32 %v298_v6, %v281_v7  ;;  %v319_v8 = vmul.f32 %v317_v27, %v316_v20  ;;  %v324_v37 = vmul.f32 %v322_v28, %v316_v20  ;;  %v329_v38 = vmul.f32 %v327_v29, %v316_v20 }
  0xed   : > { %v305_v23 = vadd.f32 %v303_v9, %v286_v13  ;;  %v310_v16 = vadd.f32 %v308_v12, %v291_v17  ;;  %v318_v18 = vmul.f32 %v317_v27, %v314_v21  ;;  %v323_v10 = vmul.f32 %v322_v28, %v314_v21 }
  0xee   : > { %v321_v11 = vadd.f32 %v319_v8, %v300_v25  ;;  %v328_v19 = vmul.f32 %v327_v29, %v314_v21 }
  0xef   : > { %v326_v26 = vadd.f32 %v324_v37, %v305_v23  ;;  %v331_v39 = vadd.f32 %v329_v38, %v310_v16  ;;  %v320_v43 = vadd.f32 %v318_v18, %v299_v22  ;;  %v325_v44 = vadd.f32 %v323_v10, %v304_v15  ;;  %v350_v47 = vpop.permute.xlu1 %349  ;;  %v348_v48 = vpop.permute.xlu0 %347 }
  0xf0   : > { %v330_v27 = vadd.f32 %v328_v19, %v309_v14  ;;  %v336_v28 = vadd.f32 %v1067_v30, %v321_v11  ;;  %v353_v29 = vmul.f32 %v351_v32, %v350_v47  ;;  %v358_v49 = vmul.f32 %v356_v35, %v350_v47 }
  0xf1   : > { %v341_v56 = vadd.f32 %v1070_v31, %v326_v26  ;;  %v346_v57 = vadd.f32 %v1077_v34, %v331_v39  ;;  %v363_v58 = vmul.f32 %v361_v40, %v350_v47  ;;  %v335_v59 = vadd.f32 %v1074_v33, %v320_v43 }
  0xf2   : > { %v355_v62 = vadd.f32 %v353_v29, %v336_v28  ;;  %v340_v63 = vadd.f32 %v1081_v36, %v325_v44  ;;  %v345_v30 = vadd.f32 %v1086_v41, %v330_v27  ;;  %v352_v0 = vmul.f32 %v351_v32, %v348_v48 }
  0xf3   : > { %v360_v2 = vadd.f32 %v358_v49, %v341_v56  ;;  %v365_v31 = vadd.f32 %v363_v58, %v346_v57  ;;  %v357_v3 = vmul.f32 %v356_v35, %v348_v48  ;;  %v362_v34 = vmul.f32 %v361_v40, %v348_v48  ;;  %v371_v4 = vpop.permute.xlu1 %370  ;;  %v369_v5 = vpop.permute.xlu0 %368 }
  0xf4   : > { %v354_v33 = vadd.f32 %v352_v0, %v335_v59  ;;  %v374_v36 = vmul.f32 %v372_v42, %v371_v4  ;;  %v379_v6 = vmul.f32 %v377_v45, %v371_v4  ;;  %v384_v41 = vmul.f32 %v382_v46, %v371_v4 }
  0xf5   : > { %v359_v32 = vadd.f32 %v357_v3, %v340_v63  ;;  %v364_v9 = vadd.f32 %v362_v34, %v345_v30  ;;  %v373_v12 = vmul.f32 %v372_v42, %v369_v5  ;;  %v378_v35 = vmul.f32 %v377_v45, %v369_v5 }
  0xf6   : > { %v376_v40 = vadd.f32 %v374_v36, %v355_v62  ;;  %v381_v7 = vadd.f32 %v379_v6, %v360_v2  ;;  %v386_v13 = vadd.f32 %v384_v41, %v365_v31  ;;  %v383_v17 = vmul.f32 %v382_v46, %v369_v5 }
  0xf7   : > { %v375_v20 = vadd.f32 %v373_v12, %v354_v33  ;;  %v380_v21 = vadd.f32 %v378_v35, %v359_v32  ;;  %v426_v22 = vstv %s1124_s13  ;;  %v432_v15 = vstv %s1127_s18  ;;  %v405_v25 = vpop.permute.xlu1 %404  ;;  %v403_v8 = vpop.permute.xlu0 %402 }
  0xf8   : > { %v385_v42 = vadd.f32 %v383_v17, %v364_v9  ;;  %v391_v45 = vadd.f32 %v1094_v50, %v376_v40  ;;  %v396_v37 = vadd.f32 %v1100_v52, %v381_v7  ;;  %v401_v38 = vadd.f32 %v1110_v60, %v386_v13 }
  0xf9   : > { %v408_v46 = vmul.f32 %v406_v51, %v405_v25  ;;  %v413_v23 = vmul.f32 %v411_v53, %v405_v25  ;;  %v418_v16 = vmul.f32 %v416_v61, %v405_v25  ;;  %v390_v18 = vadd.f32 %v1104_v54, %v375_v20 }
  0xfa   : > { %v395_v10 = vadd.f32 %v1107_v55, %v380_v21  ;;  %v400_v11 = vadd.f32 %v1118_v1, %v385_v42  ;;  %v407_v50 = vmul.f32 %v406_v51, %v403_v8  ;;  %v412_v52 = vmul.f32 %v411_v53, %v403_v8 }
  0xfb   : > { %v410_v60 = vadd.f32 %v408_v46, %v391_v45  ;;  %v415_v14 = vadd.f32 %v413_v23, %v396_v37  ;;  %v420_v19 = vadd.f32 %v418_v16, %v401_v38  ;;  %v417_v26 = vmul.f32 %v416_v61, %v403_v8 }
  0xfc   : > { %v409_v39 = vadd.f32 %v407_v50, %v390_v18  ;;  %v414_v54 = vadd.f32 %v412_v52, %v395_v10 }
  0xfd   : > { %v423_v55 = vadd.f32 %v421_v24, %v410_v60  ;;  %v428_v1 = vadd.f32 %v426_v22, %v415_v14  ;;  %v434_v43 = vadd.f32 %v432_v15, %v420_v19  ;;  %v419_v51 = vadd.f32 %v417_v26, %v400_v11 }
  0xfe   : > { %v422_v53 = vadd.f32 %v421_v24, %v409_v39  ;;  %v427_v44 = vadd.f32 %v426_v22, %v414_v54 }
  0xff   : > { %425 = vst [vmem:[%s215_s1 + $0x8] sm:$0xff] %v423_v55  ;;  %588 = vst [vmem:[%s215_s1 + $0x18] sm:$0xff] %v428_v1  ;;  %v433_v61 = vadd.f32 %v432_v15, %v419_v51 }
 0x100   : > { %590 = vst [vmem:[%s215_s1 + $0x28] sm:$0xff] %v434_v43  ;;  %424 = vst [vmem:[%s215_s1] sm:$0xff] %v422_v53 }
 0x101   : > { %587 = vst [vmem:[%s215_s1 + $0x10] sm:$0xff] %v427_v44  ;;  %589 = vst [vmem:[%s215_s1 + $0x20] sm:$0xff] %v433_v61 }
 0x102   : > { %742 = shalt.err (!%p739_p12)
}
 0x103   : > { %s743_s27 = scalar_lea.hbm %s1190_s28, 768  ;;  %s747_s8 = scalar_lea.hbm %s1238_s3, 1536 }
 0x104   : > { %p744_p11 = scmp.ne.s32.totalorder %s1190_s28, %s743_s27  ;;  %p748_p6 = scmp.lt.s32.totalorder %s1190_s28, %s1238_s3 }
 0x105   : > { %p749_p7 = scmp.lt.s32.totalorder %s747_s8, %s743_s27 }
 0x106   : > { %p745_p13 = pnand %p744_p11, %p1272_p1 }
 0x107   : > { %p750_p3 = por %p749_p7, %p748_p6 }
 0x108   : > { %p746_p0 = pneg %p745_p13 }
 0x10a   : > { %p751_p9 = pnand %p750_p3, %p746_p0 }
 0x10c   : > { %754 = shalt.err (!%p751_p9)
}
 0x10d   : > { %s812_s26 = smov 128   ;;  %s813_s11 = smov 8  }
 0x10e   : > { %607 = dma.vmem_to_hbm [thread:$0]  (%p1272_p1), %s1192_s2, 768, %s1190_s28, %s439_s5, %s812_s26, %s812_s26, %s813_s11  }
 0x10f PF: > { %s467_s10 = sand.u32 1, %s789_s12   ;;  %p1273_p5 = scmp.ne.s32.totalorder %s1258_s25, 0 }
 0x110   : > { %p1274_p2 = scmp.ge.s32.totalorder %s801_s15, 2  ;;  %s468_s4 = scalar_lea.sflag [#allocation5], %s467_s10 }
 0x112   : > { %p621_p8 = pnand %p1274_p2, %p1273_p5 }
 0x114   : > { %p622_p10 = pneg %p621_p8 }
 0x116   : > { %784 = dma.done.wait (%p622_p10), %s468_s4, 768  }
 0x117   : > { %786 = vsyncadd (%p622_p10), %s468_s4, 4294966528  ;;  %s1275_s15 = sld [smem:[#allocation17_spill]] }
 0x118   : > { %s1276_s12 = sld [smem:[#allocation15_spill]] }
 0x119   : > { %s1277_s13 = sld [smem:[#allocation16_spill]] }
 0x11a   : > { %s1278_s14 = sld [smem:[#allocation18_spill]] }
 0x11d   : > { %p18_p4 = scmp.ge.s32.totalorder %s1275_s15, 4  }
 0x11f   :  { %20 = sbr.rel (!%p18_p4) target bundleno = 11 (0xb), region = 88 }
 0x124   :  { %473 = vsyncpa [#allocation4], 1 }
 0x125   :  { %475 = vsyncpa [#allocation4 + $0x1], 1 }
 0x126   :  { %476 = vsyncpa [#allocation5], 1 }
 0x127   :  { %478 = vsyncpa [#allocation5 + $0x1], 1 }
 0x128   :  { %479 = vsyncpa [#allocation6], 1 }
 0x129   :  { %481 = vsyncpa [#allocation6 + $0x1], 1 }
 0x12a   :  { %482 = vsyncpa [#allocation9], 1 }

</bundles_post_ra>
